<compile_context>
chip_gen: v6e
topology: v6e:2x2x1
jax: 0.10.0
libtpu: 0.0.40
codegen_flags: <defaults>
</compile_context>

<pallas_src>
import functools

import jax
import jax.numpy as jnp
from jax.experimental import pallas as pl
from jax.experimental.pallas import tpu as pltpu


def _channel_attention_kernel(x_ref, w1t_ref, w2t_ref, o_ref, *, hw_true):
    # x_ref : (TB, C, HWp)  block of the input, native dtype
    # w1t_ref: (C, Ch)      fc1 weight, transposed (Conv2d(C, Ch, 1) squeezed).T
    # w2t_ref: (Ch, C)      fc2 weight, transposed (Conv2d(Ch, C, 1) squeezed).T
    xb = x_ref[...]                                   # keep in native dtype
    tb = xb.shape[0]
    hwp = xb.shape[2]

    # ---- pooled descriptors ------------------------------------------------
    # mean: accumulate in f32 (cast lives only inside the reduction path),
    # divide by the TRUE spatial size (padded lanes are zero -> no sum error).
    s = jnp.sum(xb.astype(jnp.float32), axis=-1)      # (TB, C) f32
    avg = s * (1.0 / float(hw_true))                  # (TB, C) f32

    # max: exact in the native dtype; mask padded lanes only if padding exists.
    if hwp == hw_true:
        mx = jnp.max(xb, axis=-1)                     # (TB, C)
    else:
        lane = jax.lax.broadcasted_iota(jnp.int32, xb.shape, 2)
        neg = jnp.asarray(jnp.finfo(xb.dtype).min, xb.dtype)
        mx = jnp.max(jnp.where(lane < hw_true, xb, neg), axis=-1)
    mx = mx.astype(jnp.float32)                       # (TB, C) f32

    # ---- fused shared MLP on stacked [avg; max], C on the lane axis ---------
    pooled = jnp.concatenate([avg, mx], axis=0)       # (2*TB, C) f32
    w1t = w1t_ref[...].astype(jnp.float32)            # (C, Ch)
    w2t = w2t_ref[...].astype(jnp.float32)            # (Ch, C)
    h = jnp.maximum(
        jnp.dot(pooled, w1t, preferred_element_type=jnp.float32), 0.0)  # (2*TB, Ch)
    out = jnp.dot(h, w2t, preferred_element_type=jnp.float32)           # (2*TB, C)
    gate = jax.nn.sigmoid(out[:tb] + out[tb:])        # (TB, C) f32

    # ---- broadcast multiply in the native dtype -----------------------------
    o_ref[...] = xb * gate.astype(xb.dtype)[:, :, None]


def channel_attention(x, w1, w2, *, block_bytes_target=2 << 20):
    """x: (B, C, H, W) NCHW float. w1: (C//16, C) fc1. w2: (C, C//16) fc2."""
    B, C, H, W = x.shape
    Ch = w1.shape[0]
    HW = H * W
    # Pad the flattened spatial (lane) dim to a multiple of 128 -> lane-dense
    # unmasked stores on the writeback path.
    HWp = ((HW + 127) // 128) * 128
    x_flat = x.reshape(B, C, HW)
    if HWp != HW:
        x_flat = jnp.pad(x_flat, ((0, 0), (0, 0), (0, HWp - HW)))  # zeros

    eltsize = jnp.dtype(x.dtype).itemsize
    blk1 = C * HWp * eltsize  # bytes for one batch element's block

    # Pack several batch elements per grid step when blocks are small, but keep
    # at least 2 grid steps (megacore / pipelining) whenever B >= 2.
    divisors = [d for d in range(1, B + 1) if B % d == 0]
    candidates = [d for d in divisors if d * blk1 <= block_bytes_target] or [1]
    tb = max(candidates)
    if B >= 2 and B // tb < 2:
        smaller = [d for d in candidates if B // d >= 2]
        if smaller:
            tb = max(smaller)
    grid = (B // tb,)

    # Scoped-VMEM budget: double-buffered input + output blocks + weights.
    # TODO(synk): for very large C*HW (block > ~14 MiB) split into a pooling
    # kernel producing the (B, C) gate plus a spatially tiled gate*x apply
    # kernel to stay within v7x's 64 MiB VMEM and keep double-buffering.
    w_bytes = (w1.size + w2.size) * jnp.dtype(w1.dtype).itemsize
    vmem_limit = int(min(max(4 * tb * blk1 + w_bytes + (2 << 20), 32 << 20),
                         60 << 20))

    kernel = functools.partial(_channel_attention_kernel, hw_true=HW)

    out_flat = pl.pallas_call(
        kernel,
        out_shape=jax.ShapeDtypeStruct((B, C, HWp), x.dtype),
        grid_spec=pltpu.PrefetchScalarGridSpec(
            num_scalar_prefetch=0,
            grid=grid,
            in_specs=[
                pl.BlockSpec((tb, C, HWp), lambda b: (b, 0, 0)),
                pl.BlockSpec((C, Ch), lambda b: (0, 0)),   # w1.T
                pl.BlockSpec((Ch, C), lambda b: (0, 0)),   # w2.T
            ],
            out_specs=pl.BlockSpec((tb, C, HWp), lambda b: (b, 0, 0)),
        ),
        compiler_params=pltpu.CompilerParams(
            dimension_semantics=("parallel",),
            vmem_limit_bytes=vmem_limit),
    )(x_flat, w1.T, w2.T)

    return out_flat[:, :, :HW].reshape(B, C, H, W)


def channel_attention_ref(x, w1, w2):
    # Pure-JAX reference mirroring the PyTorch forward.
    avg = jnp.mean(x, axis=(2, 3))                    # (B, C)
    mx = jnp.max(x, axis=(2, 3))                      # (B, C)

    def mlp(v):                                       # v: (B, C)
        h = jnp.maximum(v @ w1.T, 0.0)                # (B, Ch)
        return h @ w2.T                               # (B, C)

    gate = jax.nn.sigmoid(mlp(avg) + mlp(mx))         # (B, C)
    return gate[:, :, None, None] * x


if __name__ == "__main__":
    key = jax.random.PRNGKey(0)
    k_x, k_w1, k_w2, k_x2 = jax.random.split(key, 4)

    # in_planes must be >= 16 because hidden = C // 16 in the module.
    B, C, H, W = 2, 32, 16, 16
    Ch = C // 16

    x = jax.random.normal(k_x, (B, C, H, W), dtype=jnp.float32)
    # Conv2d weights are (out, in, 1, 1); store the squeezed (out, in).
    w1 = jax.random.normal(k_w1, (Ch, C), dtype=jnp.float32) * 0.1
    w2 = jax.random.normal(k_w2, (C, Ch), dtype=jnp.float32) * 0.1

    out = jax.block_until_ready(channel_attention(x, w1, w2))
    ref = channel_attention_ref(x, w1, w2)
    assert out.shape == (B, C, H, W)
    assert jnp.allclose(out, ref, atol=1e-5, rtol=1e-5), "mismatch (aligned HW)"

    # Second case exercising the HW-padding path (7*7 = 49 -> padded to 128)
    # with an all-negative channel so the masked max is actually verified.
    B2, H2, W2 = 3, 7, 7
    x2 = jax.random.normal(k_x2, (B2, C, H2, W2), dtype=jnp.float32)
    x2 = x2.at[:, 0].set(-jnp.abs(x2[:, 0]) - 1.0)
    out2 = jax.block_until_ready(channel_attention(x2, w1, w2))
    ref2 = channel_attention_ref(x2, w1, w2)
    assert out2.shape == (B2, C, H2, W2)
    assert jnp.allclose(out2, ref2, atol=1e-5, rtol=1e-5), "mismatch (padded HW)"

    print("KERNEL_OK")
</pallas_src>

<mosaic_0001>
module attributes {stable_mosaic.version = 11 : i64} {
  func.func @_channel_attention_kernel(%arg0: i32, %arg1: memref<1x32x256xf32, #tpu.memory_space<vmem>>, %arg2: memref<32x2xf32, #tpu.memory_space<vmem>>, %arg3: memref<2x32xf32, #tpu.memory_space<vmem>>, %arg4: memref<1x32x256xf32, #tpu.memory_space<vmem>>) attributes {dimension_semantics = [#tpu.dimension_semantics<parallel>], iteration_bounds = array<i64: 2>, scalar_prefetch = 0 : i64, scratch_operands = 0 : i64, tpu.core_type = #tpu.core_type<tc>, window_params = [{transform_indices = @transform_0, window_bounds = array<i64: 1, 32, 256>}, {pipeline_mode = #tpu.pipeline_mode<synchronous>, transform_indices = @transform_1, window_bounds = array<i64: 32, 2>}, {pipeline_mode = #tpu.pipeline_mode<synchronous>, transform_indices = @transform_2, window_bounds = array<i64: 2, 32>}, {transform_indices = @transform_3, window_bounds = array<i64: 1, 32, 256>}]} {
    %c0 = arith.constant 0 : index
    %c0_0 = arith.constant 0 : index
    %c0_1 = arith.constant 0 : index
    %0 = vector.load %arg1[%c0, %c0_0, %c0_1] : memref<1x32x256xf32, #tpu.memory_space<vmem>>, vector<1x32x256xf32>
    %cst = arith.constant dense<0.000000e+00> : vector<1x32xf32>
    %1 = vector.multi_reduction <add>, %0, %cst [2] : vector<1x32x256xf32> to vector<1x32xf32>
    %cst_2 = arith.constant 3.906250e-03 : f32
    %2 = vector.broadcast %cst_2 : f32 to vector<1x32xf32>
    %3 = arith.mulf %1, %2 : vector<1x32xf32>
    %cst_3 = arith.constant dense<0xFF800000> : vector<1x32xf32>
    %4 = vector.multi_reduction <maximumf>, %0, %cst_3 [2] : vector<1x32x256xf32> to vector<1x32xf32>
    %5 = tpu.concatenate %3, %4 in 0 : vector<1x32xf32>, vector<1x32xf32> -> vector<2x32xf32>
    %c0_4 = arith.constant 0 : index
    %c0_5 = arith.constant 0 : index
    %6 = vector.load %arg2[%c0_4, %c0_5] : memref<32x2xf32, #tpu.memory_space<vmem>>, vector<32x2xf32>
    %c0_6 = arith.constant 0 : index
    %c0_7 = arith.constant 0 : index
    %7 = vector.load %arg3[%c0_6, %c0_7] : memref<2x32xf32, #tpu.memory_space<vmem>>, vector<2x32xf32>
    %cst_8 = arith.constant dense<0.000000e+00> : vector<2x2xf32>
    %8 = tpu.matmul %5, %6, %cst_8 {dimension_numbers = #tpu.dot_dimension_numbers<[1], [0], [0], [1], [0, 0, 1, 1], [], []>} : vector<2x32xf32>, vector<32x2xf32>, vector<2x2xf32> -> vector<2x2xf32>
    %cst_9 = arith.constant 0.000000e+00 : f32
    %9 = vector.broadcast %cst_9 : f32 to vector<2x2xf32>
    %10 = arith.maximumf %8, %9 : vector<2x2xf32>
    %cst_10 = arith.constant dense<0.000000e+00> : vector<2x32xf32>
    %11 = tpu.matmul %10, %7, %cst_10 {dimension_numbers = #tpu.dot_dimension_numbers<[1], [0], [0], [1], [0, 0, 1, 1], [], []>} : vector<2x2xf32>, vector<2x32xf32>, vector<2x32xf32> -> vector<2x32xf32>
    %12 = vector.extract_strided_slice %11 {offsets = [0, 0], sizes = [1, 32], strides = [1, 1]} : vector<2x32xf32> to vector<1x32xf32>
    %13 = vector.extract_strided_slice %11 {offsets = [1, 0], sizes = [1, 32], strides = [1, 1]} : vector<2x32xf32> to vector<1x32xf32>
    %14 = arith.addf %12, %13 : vector<1x32xf32>
    %15 = arith.negf %14 : vector<1x32xf32>
    %16 = math.exp %15 : vector<1x32xf32>
    %cst_11 = arith.constant 1.000000e+00 : f32
    %17 = vector.broadcast %cst_11 : f32 to vector<1x32xf32>
    %18 = arith.addf %17, %16 : vector<1x32xf32>
    %19 = arith.divf %17, %18 : vector<1x32xf32>
    %20 = vector.shape_cast %19 : vector<1x32xf32> to vector<1x32x1xf32>
    %21 = vector.broadcast %20 : vector<1x32x1xf32> to vector<1x32x256xf32>
    %22 = arith.mulf %0, %21 : vector<1x32x256xf32>
    %c0_12 = arith.constant 0 : index
    %c0_13 = arith.constant 0 : index
    %c0_14 = arith.constant 0 : index
    %23 = vector.load %arg4[%c0_12, %c0_13, %c0_14] : memref<1x32x256xf32, #tpu.memory_space<vmem>>, vector<1x32x256xf32>
    tpu.vector_store %arg4[%c0_12, %c0_13, %c0_14], %22 {strides = array<i32>} : memref<1x32x256xf32, #tpu.memory_space<vmem>>, vector<1x32x256xf32>,
    return
  }
  func.func @transform_0(%arg0: i32) -> (i32, i32, i32) {
    %c0_i32 = arith.constant 0 : i32
    %c0_i32_0 = arith.constant 0 : i32
    %c0_i32_1 = arith.constant 0 : i32
    return %arg0, %c0_i32, %c0_i32_0 : i32, i32, i32
  }
  func.func @transform_1(%arg0: i32) -> (i32, i32) {
    %c0_i32 = arith.constant 0 : i32
    %c0_i32_0 = arith.constant 0 : i32
    %c0_i32_1 = arith.constant 0 : i32
    return %c0_i32, %c0_i32_0 : i32, i32
  }
  func.func @transform_2(%arg0: i32) -> (i32, i32) {
    %c0_i32 = arith.constant 0 : i32
    %c0_i32_0 = arith.constant 0 : i32
    %c0_i32_1 = arith.constant 0 : i32
    return %c0_i32, %c0_i32_0 : i32, i32
  }
  func.func @transform_3(%arg0: i32) -> (i32, i32, i32) {
    %c0_i32 = arith.constant 0 : i32
    %c0_i32_0 = arith.constant 0 : i32
    %c0_i32_1 = arith.constant 0 : i32
    return %arg0, %c0_i32, %c0_i32_0 : i32, i32, i32
  }
}

</mosaic_0001>

<bundles_post_ra>
// kernel: tpu_custom_call.1
= control target key start
LH: loop header
LB: loop body
LE: loop exit
PB: predicated region body
PF: predicated region fallthrough
CT: control target
= control target key end

     0   :  { %8 = vsyncpa [#allocation3], 0  ;;  %s1009_s0 = inlined_call_operand.hbm [shape: f32[2,32,256], index: 0, kind: input, shape index: {}]   ;;  %s1010_s1 = inlined_call_operand.vmem [shape: f32[32,2], index: 1, kind: input, shape index: {}]   ;;  %s1011_s2 = inlined_call_operand.vmem [shape: f32[2,32], index: 2, kind: input, shape index: {}]   ;;  %s1012_s3 = inlined_call_operand.hbm [shape: f32[2,32,256], index: 3, kind: output, shape index: {}]  }
   0x1   :  { %10 = vsyncpa [#allocation3 + $0x1], 0 }
   0x2   :  { %11 = vsyncpa [#allocation4], 0 }
   0x3   :  { %13 = vsyncpa [#allocation4 + $0x1], 0  ;;  %s794_s12 = smov 0   ;;  %s796_s13 = smov 0  }
   0x4   :  { %s798_s14 = smov 0   ;;  %s800_s15 = smov 0  }
   0x5 LB: > { %s815_s16 = sadd.s32 4294967295, %s764_s15   ;;  %s573_s17 = sadd.s32 4294967294, %s764_s15   ;;  %s764_s15 = sphi %s800_s15, %s1027_s15   ;;  %s760_s14 = sphi %s798_s14, %s1026_s14   ;;  %s756_s13 = sphi %s796_s13, %s1025_s13   ;;  %s752_s12 = sphi %s794_s12, %s1024_s12  }
   0x6   : > { %s819_s18 = sadd.s32 1, %s764_s15   ;;  %s26_s19 = sadd.s32 1, %s760_s14 }
   0x7   : > { %s23_s20 = ssub.s32 %s764_s15, %s819_s18  ;;  %p33_p0 = scmp.ne.s32.totalorder %s760_s14, %s756_s13 }
   0x8   : > { %p24_p1 = scmp.eq.s32.totalorder %s23_s20, 0  ;;  %p34_p2 = scmp.eq.s32.totalorder %s764_s15, 0 }
   0x9   : > { %p39_p3 = scmp.ne.s32.totalorder %s756_s13, %s752_s12  ;;  %p40_p4 = scmp.eq.s32.totalorder %s815_s16, 0 }
   0xa   : > { %s831_s21 = scalar_select %p24_p1, %s760_s14, %s26_s19  }
   0xb   : > { %p833_p5 = por %p34_p2, %p33_p0  ;;  %p837_p6 = por %p40_p4, %p39_p3 }
   0xc   : > { %p105_p7 = scmp.eq.s32.totalorder %s815_s16, 1  ;;  %p111_p8 = scmp.eq.s32.totalorder %s573_s17, 1 }
   0xd   : > { %s1016_s23 = scalar_select %p837_p6, 1, 0 }
   0xe   : > { %p628_p10 = scmp.lt.s32.totalorder %s764_s15, 2  ;;  %p844_p11 = por %p105_p7, %p33_p0 }
   0xf   : > { %p848_p12 = por %p111_p8, %p39_p3  ;;  %s137_s26 = sand.u32 1, %s760_s14  }
  0x10   : > { %s1017_s24 = scalar_select %p844_p11, 1, 0 }
  0x11   : > { %s1018_s25 = scalar_select %p848_p12, 1, 0 }
  0x12   : > { %s591_s27 = sshll.u32 %s764_s15, 10  ;;  %s576_s28 = sshll.u32 %s137_s26, 6 }
  0x13   : > { %s857_s4 = scalar_lea.hbm %s1009_s0, %s591_s27  ;;  %s141_s5 = scalar_lea.vmem [#allocation2], %s576_s28 }
  0x14   : > { %s148_s6 = sshll.u32 %s141_s5, 4  ;;  %p861_p13 = pnand %p628_p10, %p833_p5  ;;  %s865_s6 = int_to_ptr.vmem [resolvable:$true] %s148_s6 }
  0x15   : > { %s867_s8 = scalar_lea.sflag [#allocation3], %s137_s26  ;;  %s672_s9 = scalar_lea.hbm %s857_s4, 1024 }
  0x16   : > { %p673_p0 = scmp.ne.s32.totalorder %s857_s4, %s672_s9  ;;  %p674_p1 = pneg %p861_p13 }
  0x17   : > { %s677_s17 = scalar_lea.hbm %s1009_s0, 2048  ;;  %p678_p4 = scmp.lt.s32.totalorder %s857_s4, %s1009_s0 }
  0x18   : > { %p675_p2 = pnand %p674_p1, %p673_p0  ;;  %p679_p5 = scmp.lt.s32.totalorder %s677_s17, %s672_s9 }
  0x1a   : > { %p676_p3 = pneg %p675_p2  ;;  %p680_p7 = por %p679_p5, %p678_p4 }
  0x1c   : > { %p681_p8 = pnand %p680_p7, %p676_p3 }
  0x1e   : > { %684 = shalt.err (!%p681_p8)
}
  0x1f   : > { %s685_s22 = scalar_lea.vmem %s865_s6, 1024  ;;  %s766_s26 = smov [#allocation2]  }
  0x20   : > { %p686_p10 = scmp.ne.s32.totalorder %s865_s6, %s685_s22  ;;  %s690_s27 = sshll.u32 %s766_s26, 4  ;;  %s691_s27 = int_to_ptr.vmem [resolvable:$false] %s690_s27 }
  0x21   : > { %s692_s28 = scalar_lea.vmem %s691_s27, 2048  ;;  %p693_p2 = scmp.lt.s32.totalorder %s865_s6, %s691_s27 }
  0x22   : > { %p688_p9 = pnand %p686_p10, %p674_p1  ;;  %p694_p12 = scmp.lt.s32.totalorder %s692_s28, %s685_s22 }
  0x24   : > { %p689_p0 = pneg %p688_p9  ;;  %p695_p11 = por %p694_p12, %p693_p2 }
  0x26   : > { %p696_p6 = pnand %p695_p11, %p689_p0 }
  0x28   : > { %699 = shalt.err (!%p696_p6)
}
  0x29   : > { %s767_s29 = smov 256   ;;  %s768_s30 = smov 16  }
  0x2a   : > { %623 = dma.hbm_to_vmem [thread:$0]  (!%p861_p13), %s857_s4, 1024, %s865_s6, %s867_s8, %s767_s29, %s767_s29, %s768_s30  }
  0x2b   : > { %p579_p9 = scmp.ge.s32.totalorder %s764_s15, 1  ;;  %p156_p1 = scmp.lt.s32.totalorder %s764_s15, 3 }
  0x2d   : > { %p157_p3 = pnand %p579_p9, %p156_p1 }
  0x2e   : > { %s891_s5 = sand.u32 (!%p157_p3), 1, %s756_s13   ;;  %p1020_p6 = scmp.ne.s32.totalorder (!%p157_p3), %s1016_s23, 0 }
  0x2f   : > { %160 = sbr.rel (%p157_p3) target bundleno = 777 (0x309), region = 32  ;;  %s580_s9 = sshll.u32 (!%p157_p3), %s891_s5, 6 }
  0x30   : > { %s163_s10 = scalar_lea.sflag (!%p157_p3), [#allocation3], %s891_s5  ;;  %s166_s11 = scalar_lea.vmem (!%p157_p3), [#allocation2], %s580_s9 }
  0x34   : > { %743 = dma.done.wait (%p1020_p6), %s163_s10, 1024  }
  0x35   : > { %745 = vsyncadd (%p1020_p6), %s163_s10, 4294966272  ;;  %v901_v0 = vld [vmem:[%s166_s11 + $0x20] sm:$0xff]  ;;  %v903_v1 = vld [vmem:[%s166_s11 + $0x28] sm:$0xff]  ;;  %v769_v16 = vmov 0.0   ;;  %vm770_vm0 = vmmov 0   ;;  %v229_v21 = vlaneseq  ;;  %vm240_vm1 = vcmask 130112  }
  0x36   : > { %v905_v2 = vld [vmem:[%s166_s11] sm:$0xff]  ;;  %v203_v3 = vadd.f32 %v903_v1, %v901_v0  ;;  %v909_v4 = vld [vmem:[%s166_s11 + $0x8] sm:$0xff]  ;;  %v911_v5 = vld [vmem:[%s166_s11 + $0x30] sm:$0xff]  ;;  %v219_v15 = vmax.f32 %v901_v0, %v903_v1  ;;  %600 = vmatprep.subr.mxu0 %v769_v16  ;;  %611 = vmatprep.subr.mxu1 %v769_v16  ;;  %vm247_vm2 = vcmask 195712   ;;  %vm254_vm3 = vcmask 261312   ;;  %s188_s27 = scalar_lea.vmem [#allocation5], %s580_s9 }
  0x37   : > { %v913_v6 = vld [vmem:[%s166_s11 + $0x38] sm:$0xff]  ;;  %v197_v7 = vadd.f32 %v909_v4, %v905_v2  ;;  %v917_v8 = vld [vmem:[%s166_s11 + $0x10] sm:$0xff]  ;;  %v213_v13 = vmax.f32 %v905_v2, %v909_v4  ;;  %v284_v19 = vld [vmem:[%s1010_s1 + $0x8] sm:$0xff]  ;;  %608 = vmatprep.mubr.msk.f32.mxu0 %vm770_vm0, %v769_v16  ;;  %613 = vmatprep.mubr.msk.f32.mxu1 %vm770_vm0, %v769_v16  ;;  %v230_v22 = vand.u32 127, %v229_v21  ;;  %v232_v25 = vshrl.u32 %v229_v21, 7  ;;  %s500_s28 = sshll.u32 %s188_s27, 4  ;;  %s959_s28 = int_to_ptr.vmem [resolvable:$true] %s500_s28 }
  0x38   : > { %v919_v9 = vld [vmem:[%s166_s11 + $0x18] sm:$0xff]  ;;  %204 = vadd.xlane.f32.xlu1 %v203_v3  ;;  %v206_v10 = vadd.f32 %v913_v6, %v911_v5  ;;  %v222_v14 = vmax.f32 %v911_v5, %v913_v6  ;;  %v285_v18 = vld [vmem:[%s1010_s1 + $0x10] sm:$0xff]  ;;  %v283_v20 = vld [vmem:[%s1010_s1] sm:$0xff]  ;;  %vm281_vm4 = vcmask 1040384   ;;  %vm288_vm5 = vcmask 261120   ;;  %s592_s29 = sshll.u32 %s815_s16, 10 }
  0x39   : > { %198 = vadd.xlane.f32.xlu0 %v197_v7  ;;  %v200_v11 = vadd.f32 %v919_v9, %v917_v8  ;;  %v216_v12 = vmax.f32 %v917_v8, %v919_v9  ;;  %v286_v17 = vld [vmem:[%s1010_s1 + $0x18] sm:$0xff]  ;;  %v235_v24 = vadd.s32 4294967288, %v230_v22  ;;  %v242_v27 = vadd.s32 4294967280, %v230_v22  ;;  %v287_v58 = vld [vmem:[%s1011_s2] sm:$0x3]  ;;  %s964_s10 = scalar_lea.hbm %s1012_s3, %s592_s29  ;;  %s487_s16 = scalar_lea.sflag [#allocation4], %s891_s5 }
  0x3a   : > { %601 = vmatpush3.msra.mxu0 %v286_v17  ;;  %v233_v30 = vsub.s32 %v230_v22, %v232_v25  ;;  %v249_v32 = vadd.s32 4294967272, %v230_v22  ;;  %vm367_vm6 = vcmask 1041408   ;;  %vm363_vm7 = vcmask 15360   ;;  %s700_s11 = scalar_lea.vmem %s959_s28, 1024  ;;  %p1021_p12 = scmp.ne.s32.totalorder %s1017_s24, 0 }
  0x3b   : > { %602 = vmatprep.subr.mxu0 %v769_v16  ;;  %v238_v29 = vsub.s32 %v235_v24, %v232_v25  ;;  %v245_v35 = vsub.s32 %v242_v27, %v232_v25  ;;  %612 = vmatpush3.msk.msra.mxu1 %vm367_vm6, %v287_v58  ;;  %p701_p11 = scmp.ne.s32.totalorder %s959_s28, %s700_s11  ;;  %s771_s23 = smov [#allocation5]  }
  0x3c   : > { %207 = vadd.xlane.f32.xlu1 %v206_v10  ;;  %603 = vmatpush3.msra.mxu0 %v285_v18  ;;  %v252_v40 = vsub.s32 %v249_v32, %v232_v25  ;;  %s704_s4 = sshll.u32 %s771_s23, 4  ;;  %s705_s4 = int_to_ptr.vmem [resolvable:$false] %s704_s4 }
  0x3d   : > { %201 = vadd.xlane.f32.xlu0 %v200_v11  ;;  %604 = vmatprep.subr.mxu0 %v769_v16  ;;  %p702_p13 = pnand %p701_p11, %p1021_p12  ;;  %s706_s6 = scalar_lea.vmem %s705_s4, 2048 }
  0x3e   : > { %605 = vmatpush3.msra.mxu0 %v284_v19  ;;  %p707_p5 = scmp.lt.s32.totalorder %s959_s28, %s705_s4  ;;  %p708_p7 = scmp.lt.s32.totalorder %s706_s6, %s700_s11 }
  0x3f   : > { %606 = vmatprep.subr.mxu0 %v769_v16  ;;  %p703_p4 = pneg %p702_p13 }
  0x40   : > { %217 = vmax.xlane.f32.xlu1 %v216_v12  ;;  %607 = vmatpush3.msra.mxu0 %v283_v20  ;;  %p709_p8 = por %p708_p7, %p707_p5 }
  0x41   : > { %214 = vmax.xlane.f32.xlu0 %v213_v13  ;;  %v453_v13 = vsub.s32 0, %v232_v25 }
  0x42   : > { %p710_p10 = pnand %p709_p8, %p703_p4 }
  0x44   : > { %223 = vmax.xlane.f32.xlu1 %v222_v14 }
  0x45   : > { %220 = vmax.xlane.f32.xlu0 %v219_v15 }
  0xc1   : > { %v205_v23 = vpop.xlane.xlu1 %204 }
  0xc2   : > { %v199_v26 = vpop.xlane.xlu0 %198  ;;  %v211_v36 = vmul.f32 0.00390625, %v205_v23 }
  0xc3   : > { %v209_v31 = vmul.f32 0.00390625, %v199_v26 }
  0xc4   : > { %v246_v46 = vrot.slane %v211_v36, %v245_v35 }
  0xc5   : > { %v208_v28 = vpop.xlane.xlu1 %207  ;;  %v234_v39 = vrot.slane %v209_v31, %v233_v30 }
  0xc6   : > { %v202_v33 = vpop.xlane.xlu0 %201  ;;  %v212_v41 = vmul.f32 0.00390625, %v208_v28 }
  0xc7   : > { %v210_v34 = vmul.f32 0.00390625, %v202_v33 }
  0xc8   : > { %v253_v48 = vrot.slane %v212_v41, %v252_v40 }
  0xc9   : > { %v239_v37 = vrot.slane %v210_v34, %v238_v29  ;;  %v218_v38 = vpop.xlane.xlu1 %217 }
  0xca   : > { %v215_v42 = vpop.xlane.xlu0 %214  ;;  %v268_v44 = vrot.slane %v218_v38, %v238_v29 }
  0xcb   : > { %v241_v43 = vsel %vm240_vm1, %v239_v37, %v234_v39  ;;  %v264_v45 = vrot.slane %v215_v42, %v233_v30 }
  0xcc   : > { %v248_v52 = vsel %vm247_vm2, %v246_v46, %v241_v43 }
  0xcd   : > { %v224_v47 = vpop.xlane.xlu1 %223  ;;  %v269_v53 = vsel %vm240_vm1, %v268_v44, %v264_v45  ;;  %v255_v56 = vsel %vm254_vm3, %v253_v48, %v248_v52 }
  0xce   : > { %v221_v49 = vpop.xlane.xlu0 %220  ;;  %v278_v50 = vrot.slane %v224_v47, %v252_v40 }
  0xcf   : > { %v273_v51 = vrot.slane %v221_v49, %v245_v35 }
  0xd1   : > { %v274_v54 = vsel %vm247_vm2, %v273_v51, %v269_v53 }
  0xd2   : > { %v279_v55 = vsel %vm254_vm3, %v278_v50, %v274_v54 }
  0xd3   : > { %v282_v57 = vsel %vm281_vm4, %v255_v56, %v279_v55 }
  0xd4   : > { %609 = vmatmul.mubr.msk.f32.vlgmr.msra.gmra.mxu0 %vm288_vm5, %v282_v57 }
 0x194   : > { %v358_v59 = vpop.f32.mrf.mxu0 }
 0x195   : > { %v362_v60 = vmax.f32 %v358_v59, 0.0 }
 0x196   : > { %v610_v61 = vpop.f32.mrf.mxu0 }
 0x197   : > { %614 = vmatmul.mubr.msk.f32.vlgmr.msra.gmra.mxu1 %vm363_vm7, %v362_v60 }
 0x257   : > { %v437_v62 = vpop.f32.mrf.mxu1 }
 0x258   : > { %v442_v63 = vrot.slane %v437_v62, 1 }
 0x259   : > { %v615_v3 = vpop.f32.mrf.mxu1 }
 0x25a   : > { %v444_v7 = vadd.f32 %v442_v63, %v437_v62 }
 0x25c   : > { %v585_v10 = vmul.f32 -1.442695, %v444_v7 }
 0x25e   : > { %668 = vpow2.f32 %v585_v10 }
 0x26b   : > { %v669_v11 = vpop.eup %668 }
 0x26c   : > { %v448_v12 = vadd.f32 1.0, %v669_v11 }
 0x26e   : > { %670 = vrcp.f32 %v448_v12 }
 0x27b   : > { %v671_v14 = vpop.eup %670 }
 0x27c   : > { %v454_v15 = vrot.slane %v671_v14, %v453_v13 }
 0x27e   : > { %460 = vbcast.lane.b32.xlu1 %v454_v15, 264  ;;  %456 = vbcast.lane.b32.xlu0 %v454_v15, 256 }
 0x282   : > { %464 = vbcast.lane.b32.xlu1 %v454_v15, 272 }
 0x286   : > { %468 = vbcast.lane.b32.xlu1 %v454_v15, 280 }
 0x2f0   : > { %v461_v16 = vpop.permute.xlu1 %460  ;;  %v457_v17 = vpop.permute.xlu0 %456 }
 0x2f1   : > { %v472_v18 = vmul.f32 %v461_v16, %v917_v8  ;;  %v473_v19 = vmul.f32 %v461_v16, %v919_v9  ;;  %v470_v20 = vmul.f32 %v457_v17, %v905_v2  ;;  %v471_v21 = vmul.f32 %v457_v17, %v909_v4 }
 0x2f3   : > { %480 = vst [vmem:[%s188_s27 + $0x10] sm:$0xff] %v472_v18  ;;  %481 = vst [vmem:[%s188_s27 + $0x18] sm:$0xff] %v473_v19 }
 0x2f4   : > { %478 = vst [vmem:[%s188_s27] sm:$0xff] %v470_v20  ;;  %479 = vst [vmem:[%s188_s27 + $0x8] sm:$0xff] %v471_v21  ;;  %v465_v22 = vpop.permute.xlu1 %464 }
 0x2f5   : > { %v474_v23 = vmul.f32 %v465_v22, %v901_v0  ;;  %v475_v8 = vmul.f32 %v465_v22, %v903_v1 }
 0x2f7   : > { %482 = vst [vmem:[%s188_s27 + $0x20] sm:$0xff] %v474_v23  ;;  %483 = vst [vmem:[%s188_s27 + $0x28] sm:$0xff] %v475_v8 }
 0x2f8   : > { %v469_v2 = vpop.permute.xlu1 %468 }
 0x2f9   : > { %v476_v4 = vmul.f32 %v469_v2, %v911_v5  ;;  %v477_v0 = vmul.f32 %v469_v2, %v913_v6 }
 0x2fb   : > { %484 = vst [vmem:[%s188_s27 + $0x30] sm:$0xff] %v476_v4  ;;  %485 = vst [vmem:[%s188_s27 + $0x38] sm:$0xff] %v477_v0 }
 0x2fc   : > { %713 = shalt.err (!%p710_p10)
}
 0x2fd   : > { %s714_s7 = scalar_lea.hbm %s964_s10, 1024  ;;  %s718_s19 = scalar_lea.hbm %s1012_s3, 2048 }
 0x2fe   : > { %p715_p0 = scmp.ne.s32.totalorder %s964_s10, %s714_s7  ;;  %p719_p1 = scmp.lt.s32.totalorder %s964_s10, %s1012_s3 }
 0x2ff   : > { %p720_p3 = scmp.lt.s32.totalorder %s718_s19, %s714_s7 }
 0x300   : > { %p716_p2 = pnand %p715_p0, %p1021_p12 }
 0x301   : > { %p721_p6 = por %p720_p3, %p719_p1 }
 0x302   : > { %p717_p9 = pneg %p716_p2 }
 0x304   : > { %p722_p11 = pnand %p721_p6, %p717_p9 }
 0x306   : > { %725 = shalt.err (!%p722_p11)
}
 0x307   : > { %s772_s26 = smov 256   ;;  %s773_s27 = smov 16  }
 0x308   : > { %618 = dma.vmem_to_hbm [thread:$0]  (%p1021_p12), %s959_s28, 1024, %s964_s10, %s487_s16, %s772_s26, %s772_s26, %s773_s27  }
 0x309 PF: > { %s515_s29 = sand.u32 1, %s752_s12   ;;  %p1022_p13 = scmp.ne.s32.totalorder %s1018_s25, 0 }
 0x30a   : > { %p1023_p4 = scmp.ge.s32.totalorder %s764_s15, 2  ;;  %s516_s30 = scalar_lea.sflag [#allocation4], %s515_s29 }
 0x30c   : > { %p625_p5 = pnand %p1023_p4, %p1022_p13 }
 0x30e   : > { %p626_p7 = pneg %p625_p5 }
 0x310   : > { %747 = dma.done.wait (%p626_p7), %s516_s30, 1024  }
 0x311   : > { %749 = vsyncadd (%p626_p7), %s516_s30, 4294966272  ;;  %p16_p8 = scmp.ge.s32.totalorder %s819_s18, 4   ;;  %s1024_s12 = smov %s756_s13 }
 0x312   : > { %s1025_s13 = smov %s760_s14  ;;  %s1026_s14 = smov %s831_s21 }
 0x313   : > { %s1027_s15 = smov %s819_s18  ;;  %18 = sbr.rel (!%p16_p8) target bundleno = 5 (0x5), region = 77 }
 0x318   :  { %521 = vsyncpa [#allocation3], 1 }
 0x319   :  { %523 = vsyncpa [#allocation3 + $0x1], 1 }
 0x31a   :  { %524 = vsyncpa [#allocation4], 1 }
 0x31b   :  { %526 = vsyncpa [#allocation4 + $0x1], 1 }

</bundles_post_ra>
